<compile_context>
chip_gen: v6e
topology: v6e:2x2x1
jax: 0.10.0
libtpu: 0.0.40
codegen_flags: <defaults>
</compile_context>

<pallas_src>
import functools

import jax
import jax.numpy as jnp
from jax.experimental import pallas as pl
from jax.experimental.pallas import tpu as pltpu


def _round_up(n, m):
    return ((n + m - 1) // m) * m


def _mlp_kernel(xt_ref, w1t_ref, b1_ref, w2t_ref, b2_ref, w3t_ref, b3_ref, o_ref):
    # xt_ref: (10, TB)   weights are W^T: (16,10), (16,16), (1,16)
    # biases are columns: (16,1), (16,1), (1,1)   output: (1, TB)
    xt = xt_ref[...]

    # Layer 1: Linear(10, 16) + ReLU   ->  (16, TB)
    h1 = jnp.dot(w1t_ref[...], xt, preferred_element_type=jnp.float32) + b1_ref[...]
    h1 = jnp.maximum(h1, 0.0)

    # Layer 2: Linear(16, 16) + ReLU   ->  (16, TB)
    h2 = jnp.dot(w2t_ref[...], h1, preferred_element_type=jnp.float32) + b2_ref[...]
    h2 = jnp.maximum(h2, 0.0)

    # Layer 3: Linear(16, 1) + Sigmoid ->  (1, TB), lane-dense unmasked store
    z = jnp.dot(w3t_ref[...], h2, preferred_element_type=jnp.float32) + b3_ref[...]
    o_ref[...] = 0.5 * (jnp.tanh(0.5 * z) + 1.0)


@functools.partial(jax.jit, static_argnames=("tb",))
def sequential_nn_forward(x, params, *, tb=4096):
    """x: (B, 10) float32 -> (B, 1) float32."""
    w1, b1, w2, b2, w3, b3 = params
    B = x.shape[0]

    # Batch tile: lane axis wants multiples of 128; cap at `tb` (4K rows is
    # ~160 KiB/tile double-buffered -> comfortably inside v7x's smaller VMEM).
    tb = _round_up(tb, 128)
    TB = min(tb, _round_up(B, 128))
    B_pad = _round_up(B, TB)
    n_tiles = B_pad // TB

    # Wrapper-side layout plumbing: batch -> lanes.
    x_pad = jnp.pad(x.astype(jnp.float32), ((0, B_pad - B), (0, 0)))
    xt = x_pad.T                      # (10, B_pad)
    w1t, w2t, w3t = w1.T, w2.T, w3.T  # (16,10), (16,16), (1,16)
    b1c, b2c, b3c = b1.T, b2.T, b3.T  # (16,1),  (16,1),  (1,1)

    resident = lambda arr: pl.BlockSpec(arr.shape, lambda i: (0, 0))

    ce = pl.CostEstimate(
        flops=2 * B_pad * (10 * 16 + 16 * 16 + 16 * 1),
        transcendentals=B_pad,
        bytes_accessed=(B_pad * 10 + B_pad) * 4
        + (w1.size + b1.size + w2.size + b2.size + w3.size + b3.size) * 4,
    )

    out_t = pl.pallas_call(
        _mlp_kernel,
        out_shape=jax.ShapeDtypeStruct((1, B_pad), jnp.float32),
        grid=(n_tiles,),
        in_specs=[
            pl.BlockSpec((10, TB), lambda i: (0, i)),   # x^T, streamed over batch
            resident(w1t), resident(b1c),
            resident(w2t), resident(b2c),
            resident(w3t), resident(b3c),
        ],
        out_specs=pl.BlockSpec((1, TB), lambda i: (0, i)),
        compiler_params=pltpu.CompilerParams(
            dimension_semantics=("parallel",),
        ),
        cost_estimate=ce,
    )(xt, w1t, b1c, w2t, b2c, w3t, b3c)

    return out_t[:, :B].T             # (B, 1)


def init_params(key):
    """Deterministic init mirroring nn.Linear shapes (stored as (in, out))."""
    k1, k2, k3, k4, k5, k6 = jax.random.split(key, 6)

    def uniform(k, shape, fan_in):
        bound = 1.0 / jnp.sqrt(jnp.asarray(fan_in, jnp.float32))
        return jax.random.uniform(k, shape, jnp.float32, -bound, bound)

    w1 = uniform(k1, (10, 16), 10)
    b1 = uniform(k2, (1, 16), 10)
    w2 = uniform(k3, (16, 16), 16)
    b2 = uniform(k4, (1, 16), 16)
    w3 = uniform(k5, (16, 1), 16)
    b3 = uniform(k6, (1, 1), 16)
    return (w1, b1, w2, b2, w3, b3)


def reference_forward(x, params):
    """Pure-JAX reference of the same forward pass."""
    w1, b1, w2, b2, w3, b3 = params
    h1 = jax.nn.relu(x @ w1 + b1)
    h2 = jax.nn.relu(h1 @ w2 + b2)
    return jax.nn.sigmoid(h2 @ w3 + b3)


if __name__ == "__main__":
    key = jax.random.PRNGKey(0)
    k_x, k_p = jax.random.split(key)

    B = 8  # small batch for the smoke test (kernel tiles/pads to lane width)
    x = jax.random.normal(k_x, (B, 10), dtype=jnp.float32)
    params = init_params(k_p)

    out = sequential_nn_forward(x, params)
    out = jax.block_until_ready(out)

    ref = reference_forward(x, params)
    assert out.shape == (B, 1), out.shape
    assert jnp.allclose(out, ref, atol=1e-5, rtol=1e-5), "mismatch vs reference"

    print("KERNEL_OK")
</pallas_src>

<mosaic_0001>
module attributes {stable_mosaic.version = 11 : i64} {
  func.func @_mlp_kernel(%arg0: i32, %arg1: memref<10x128xf32, #tpu.memory_space<vmem>>, %arg2: memref<16x10xf32, #tpu.memory_space<vmem>>, %arg3: memref<16x1xf32, #tpu.memory_space<vmem>>, %arg4: memref<16x16xf32, #tpu.memory_space<vmem>>, %arg5: memref<16x1xf32, #tpu.memory_space<vmem>>, %arg6: memref<1x16xf32, #tpu.memory_space<vmem>>, %arg7: memref<1x1xf32, #tpu.memory_space<vmem>>, %arg8: memref<1x128xf32, #tpu.memory_space<vmem>>) attributes {dimension_semantics = [#tpu.dimension_semantics<parallel>], iteration_bounds = array<i64: 1>, scalar_prefetch = 0 : i64, scratch_operands = 0 : i64, tpu.core_type = #tpu.core_type<tc>, window_params = [{transform_indices = @transform_0, window_bounds = array<i64: 10, 128>}, {pipeline_mode = #tpu.pipeline_mode<synchronous>, transform_indices = @transform_1, window_bounds = array<i64: 16, 10>}, {pipeline_mode = #tpu.pipeline_mode<synchronous>, transform_indices = @transform_2, window_bounds = array<i64: 16, 1>}, {pipeline_mode = #tpu.pipeline_mode<synchronous>, transform_indices = @transform_3, window_bounds = array<i64: 16, 16>}, {pipeline_mode = #tpu.pipeline_mode<synchronous>, transform_indices = @transform_4, window_bounds = array<i64: 16, 1>}, {pipeline_mode = #tpu.pipeline_mode<synchronous>, transform_indices = @transform_5, window_bounds = array<i64: 1, 16>}, {pipeline_mode = #tpu.pipeline_mode<synchronous>, transform_indices = @transform_6, window_bounds = array<i64: 1, 1>}, {transform_indices = @transform_7, window_bounds = array<i64: 1, 128>}]} {
    %c0 = arith.constant 0 : index
    %c0_0 = arith.constant 0 : index
    %0 = vector.load %arg1[%c0, %c0_0] : memref<10x128xf32, #tpu.memory_space<vmem>>, vector<10x128xf32>
    %c0_1 = arith.constant 0 : index
    %c0_2 = arith.constant 0 : index
    %1 = vector.load %arg2[%c0_1, %c0_2] : memref<16x10xf32, #tpu.memory_space<vmem>>, vector<16x10xf32>
    %cst = arith.constant dense<0.000000e+00> : vector<16x128xf32>
    %2 = tpu.matmul %1, %0, %cst {dimension_numbers = #tpu.dot_dimension_numbers<[1], [0], [0], [1], [0, 0, 1, 1], [], []>} : vector<16x10xf32>, vector<10x128xf32>, vector<16x128xf32> -> vector<16x128xf32>
    %c0_3 = arith.constant 0 : index
    %c0_4 = arith.constant 0 : index
    %3 = vector.load %arg3[%c0_3, %c0_4] : memref<16x1xf32, #tpu.memory_space<vmem>>, vector<16x1xf32>
    %4 = vector.broadcast %3 : vector<16x1xf32> to vector<16x128xf32>
    %5 = arith.addf %2, %4 : vector<16x128xf32>
    %cst_5 = arith.constant 0.000000e+00 : f32
    %6 = vector.broadcast %cst_5 : f32 to vector<16x128xf32>
    %7 = arith.maximumf %5, %6 : vector<16x128xf32>
    %c0_6 = arith.constant 0 : index
    %c0_7 = arith.constant 0 : index
    %8 = vector.load %arg4[%c0_6, %c0_7] : memref<16x16xf32, #tpu.memory_space<vmem>>, vector<16x16xf32>
    %cst_8 = arith.constant dense<0.000000e+00> : vector<16x128xf32>
    %9 = tpu.matmul %8, %7, %cst_8 {dimension_numbers = #tpu.dot_dimension_numbers<[1], [0], [0], [1], [0, 0, 1, 1], [], []>} : vector<16x16xf32>, vector<16x128xf32>, vector<16x128xf32> -> vector<16x128xf32>
    %c0_9 = arith.constant 0 : index
    %c0_10 = arith.constant 0 : index
    %10 = vector.load %arg5[%c0_9, %c0_10] : memref<16x1xf32, #tpu.memory_space<vmem>>, vector<16x1xf32>
    %11 = vector.broadcast %10 : vector<16x1xf32> to vector<16x128xf32>
    %12 = arith.addf %9, %11 : vector<16x128xf32>
    %cst_11 = arith.constant 0.000000e+00 : f32
    %13 = vector.broadcast %cst_11 : f32 to vector<16x128xf32>
    %14 = arith.maximumf %12, %13 : vector<16x128xf32>
    %c0_12 = arith.constant 0 : index
    %c0_13 = arith.constant 0 : index
    %15 = vector.load %arg6[%c0_12, %c0_13] : memref<1x16xf32, #tpu.memory_space<vmem>>, vector<1x16xf32>
    %cst_14 = arith.constant dense<0.000000e+00> : vector<1x128xf32>
    %16 = tpu.matmul %15, %14, %cst_14 {dimension_numbers = #tpu.dot_dimension_numbers<[1], [0], [0], [1], [0, 0, 1, 1], [], []>} : vector<1x16xf32>, vector<16x128xf32>, vector<1x128xf32> -> vector<1x128xf32>
    %c0_15 = arith.constant 0 : index
    %c0_16 = arith.constant 0 : index
    %17 = vector.load %arg7[%c0_15, %c0_16] : memref<1x1xf32, #tpu.memory_space<vmem>>, vector<1x1xf32>
    %18 = vector.broadcast %17 : vector<1x1xf32> to vector<1x128xf32>
    %19 = arith.addf %16, %18 : vector<1x128xf32>
    %cst_17 = arith.constant 5.000000e-01 : f32
    %20 = vector.broadcast %cst_17 : f32 to vector<1x128xf32>
    %21 = arith.mulf %20, %19 : vector<1x128xf32>
    %22 = math.tanh %21 : vector<1x128xf32>
    %cst_18 = arith.constant 1.000000e+00 : f32
    %23 = vector.broadcast %cst_18 : f32 to vector<1x128xf32>
    %24 = arith.addf %22, %23 : vector<1x128xf32>
    %cst_19 = arith.constant 5.000000e-01 : f32
    %25 = vector.broadcast %cst_19 : f32 to vector<1x128xf32>
    %26 = arith.mulf %25, %24 : vector<1x128xf32>
    %c0_20 = arith.constant 0 : index
    %c0_21 = arith.constant 0 : index
    %27 = vector.load %arg8[%c0_20, %c0_21] : memref<1x128xf32, #tpu.memory_space<vmem>>, vector<1x128xf32>
    tpu.vector_store %arg8[%c0_20, %c0_21], %26 {strides = array<i32>} : memref<1x128xf32, #tpu.memory_space<vmem>>, vector<1x128xf32>,
    return
  }
  func.func @transform_0(%arg0: i32) -> (i32, i32) {
    %c0_i32 = arith.constant 0 : i32
    %c0_i32_0 = arith.constant 0 : i32
    return %c0_i32, %arg0 : i32, i32
  }
  func.func @transform_1(%arg0: i32) -> (i32, i32) {
    %c0_i32 = arith.constant 0 : i32
    %c0_i32_0 = arith.constant 0 : i32
    %c0_i32_1 = arith.constant 0 : i32
    return %c0_i32, %c0_i32_0 : i32, i32
  }
  func.func @transform_2(%arg0: i32) -> (i32, i32) {
    %c0_i32 = arith.constant 0 : i32
    %c0_i32_0 = arith.constant 0 : i32
    %c0_i32_1 = arith.constant 0 : i32
    return %c0_i32, %c0_i32_0 : i32, i32
  }
  func.func @transform_3(%arg0: i32) -> (i32, i32) {
    %c0_i32 = arith.constant 0 : i32
    %c0_i32_0 = arith.constant 0 : i32
    %c0_i32_1 = arith.constant 0 : i32
    return %c0_i32, %c0_i32_0 : i32, i32
  }
  func.func @transform_4(%arg0: i32) -> (i32, i32) {
    %c0_i32 = arith.constant 0 : i32
    %c0_i32_0 = arith.constant 0 : i32
    %c0_i32_1 = arith.constant 0 : i32
    return %c0_i32, %c0_i32_0 : i32, i32
  }
  func.func @transform_5(%arg0: i32) -> (i32, i32) {
    %c0_i32 = arith.constant 0 : i32
    %c0_i32_0 = arith.constant 0 : i32
    %c0_i32_1 = arith.constant 0 : i32
    return %c0_i32, %c0_i32_0 : i32, i32
  }
  func.func @transform_6(%arg0: i32) -> (i32, i32) {
    %c0_i32 = arith.constant 0 : i32
    %c0_i32_0 = arith.constant 0 : i32
    %c0_i32_1 = arith.constant 0 : i32
    return %c0_i32, %c0_i32_0 : i32, i32
  }
  func.func @transform_7(%arg0: i32) -> (i32, i32) {
    %c0_i32 = arith.constant 0 : i32
    %c0_i32_0 = arith.constant 0 : i32
    return %c0_i32, %arg0 : i32, i32
  }
}

</mosaic_0001>

<bundles_post_ra>
// kernel: sequential_nn_forward.1
= control target key start
LH: loop header
LB: loop body
LE: loop exit
PB: predicated region body
PF: predicated region fallthrough
CT: control target
= control target key end

     0   :  { %vm51_vm0 = vcmask 1041408   ;;  %vm44_vm1 = vcmask 80896   ;;  %v368_v3 = vmov 0   ;;  %vm146_vm2 = vcmask 130048   ;;  %s457_s0 = inlined_call_operand.vmem [shape: f32[10,128], index: 0, kind: input, shape index: {}]   ;;  %s458_s1 = inlined_call_operand.vmem [shape: f32[16,10], index: 1, kind: input, shape index: {}]   ;;  %s459_s2 = inlined_call_operand.vmem [shape: f32[16,1], index: 2, kind: input, shape index: {}]   ;;  %s460_s6 = inlined_call_operand.<no memory space> [shape: f32[1,1], index: 6, kind: input, shape index: {}]   ;;  %s461_s3 = inlined_call_operand.vmem [shape: f32[16,16], index: 3, kind: input, shape index: {}]   ;;  %s462_s4 = inlined_call_operand.vmem [shape: f32[16,1], index: 4, kind: input, shape index: {}]   ;;  %s463_s5 = inlined_call_operand.vmem [shape: f32[1,16], index: 5, kind: input, shape index: {}]   ;;  %s464_s7 = inlined_call_operand.vmem [shape: f32[1,128], index: 7, kind: output, shape index: {}]  }
   0x1   :  { %v29_v0 = vld [vmem:[%s457_s0 + $0x8] sm:$0x3]  ;;  %v28_v1 = vld [vmem:[%s457_s0] sm:$0xff]  ;;  %364 = vset.pattern.permute.xlu0 %v368_v3  ;;  %v12_v4 = vstv %s460_s6  ;;  %365 = vset.pattern.permute.xlu1 %v368_v3  ;;  %v369_v21 = vmov 0.0   ;;  %vm370_vm3 = vmmov 0   ;;  %v237_v31 = vlaneseq }
   0x2   :  { %v30_v2 = vld [vmem:[%s458_s1] sm:$0xff]  ;;  %340 = vmatprep.subr.msk.mxu0 %vm51_vm0, %v29_v0  ;;  %v33_v5 = vld [vmem:[%s459_s2 + $0x8] sm:$0xff]  ;;  %13 = vst [vmem:[#allocation2] sm:$0x1] %v12_v4 }
   0x3   :  { %344 = vmatprep.mubr.msk.f32.mxu0 %vm44_vm1, %v30_v2  ;;  %341 = vmatpush3.msk.msra.mxu0 %vm51_vm0, %v29_v0  ;;  %v31_v6 = vld [vmem:[%s458_s1 + $0x8] sm:$0xff]  ;;  %v32_v7 = vld [vmem:[%s459_s2] sm:$0xff]  ;;  %v238_v32 = vshrl.u32 %v237_v31, 7 }
   0x4   :  { %41 = vperm.xlu0 %364, %v33_v5   ;;  %342 = vmatprep.subr.mxu0 %v28_v1  ;;  %v132_v9 = vld [vmem:[%s461_s3] sm:$0xff]  ;;  %v135_v10 = vld [vmem:[%s462_s4 + $0x8] sm:$0xff] }
   0x5   :  { %343 = vmatpush3.msra.mxu0 %v28_v1  ;;  %351 = vmatprep.mubr.msk.f32.mxu1 %vm146_vm2, %v132_v9  ;;  %v134_v11 = vld [vmem:[%s462_s4] sm:$0xff]  ;;  %v133_v20 = vld [vmem:[%s461_s3 + $0x8] sm:$0xff]  ;;  %v239_v33 = vsub.s32 0, %v238_v32 }
   0x6   :  { %345 = vmatmul.mubr.msk.f32.vlgmr.msra.gmra.mxu0 %vm44_vm1, %v31_v6  ;;  %143 = vperm.xlu1 %365, %v135_v10   ;;  %v230_v30 = vld [vmem:[%s463_s5] sm:$0x1] }
   0x7   :  { %354 = vmatprep.subr.mxu0 %v369_v21  ;;  %358 = vmatprep.mubr.msk.f32.mxu0 %vm370_vm3, %v369_v21 }
   0x8   :  { %36 = vperm.xlu0 %364, %v32_v7  }
   0x9   :  { %v231_v8 = vld [vmem:[#allocation2] sm:$0x1] }
   0xa   :  { %138 = vperm.xlu1 %365, %v134_v11  }
   0xc   :  { %234 = vperm.xlu0 %364, %v231_v8  }
  0x7f   :  { %v42_v12 = vpop.permute.xlu0 %41 }
  0x81   :  { %v144_v22 = vpop.permute.xlu1 %143 }
  0x83   :  { %v37_v15 = vpop.permute.xlu0 %36 }
  0x85   :  { %v139_v25 = vpop.permute.xlu1 %138 }
  0x87   :  { %v235_v34 = vpop.permute.xlu0 %234 }
  0x88   :  { %v240_v35 = vrot.slane %v235_v34, %v239_v33 }
  0xc6   :  { %v346_v13 = vpop.f32.mrf.mxu0 }
  0xc7   :  { %v127_v14 = vadd.f32 %v346_v13, %v42_v12 }
  0xc8   :  { %v121_v16 = vpop.f32.mrf.mxu0 }
  0xc9   :  { %v131_v17 = vmax.f32 %v127_v14, 0.0  ;;  %v122_v18 = vadd.f32 %v121_v16, %v37_v15 }
  0xcb   :  { %v130_v19 = vmax.f32 %v122_v18, 0.0  ;;  %347 = vmatprep.subr.mxu1 %v131_v17 }
  0xcc   :  { %348 = vmatpush3.msra.mxu1 %v131_v17 }
  0xcd   :  { %349 = vmatprep.subr.mxu1 %v130_v19 }
  0xce   :  { %350 = vmatpush3.msra.mxu1 %v130_v19 }
  0xcf   :  { %352 = vmatmul.mubr.msk.f32.vlgmr.msra.gmra.mxu1 %vm146_vm2, %v133_v20 }
 0x18f   :  { %v353_v23 = vpop.f32.mrf.mxu1 }
 0x190   :  { %v225_v24 = vadd.f32 %v353_v23, %v144_v22 }
 0x191   :  { %v219_v26 = vpop.f32.mrf.mxu1 }
 0x192   :  { %v229_v27 = vmax.f32 %v225_v24, 0.0  ;;  %v220_v28 = vadd.f32 %v219_v26, %v139_v25 }
 0x194   :  { %v228_v29 = vmax.f32 %v220_v28, 0.0  ;;  %355 = vmatpush3.msra.mxu0 %v229_v27 }
 0x195   :  { %356 = vmatprep.subr.mxu0 %v369_v21 }
 0x196   :  { %357 = vmatpush3.msra.mxu0 %v228_v29 }
 0x197   :  { %359 = vmatmul.mubr.msk.f32.vlgmr.msra.gmra.mxu0 %vm146_vm2, %v230_v30 }
 0x257   :  { %v310_v36 = vpop.f32.mrf.mxu0 }
 0x258   :  { %v311_v37 = vadd.f32 %v310_v36, %v240_v35 }
 0x259   :  { %v360_v38 = vpop.f32.mrf.mxu0 }
 0x25a   :  { %v314_v39 = vmul.f32 0.5, %v311_v37 }
 0x25c   :  { %366 = vtanh.f32 %v314_v39 }
 0x269   :  { %v367_v40 = vpop.eup %366 }
 0x26a   :  { %v316_v41 = vadd.f32 1.0, %v367_v40 }
 0x26c   :  { %v317_v42 = vmul.f32 0.5, %v316_v41 }
 0x26e   :  { %318 = vst [vmem:[%s464_s7] sm:$0x1] %v317_v42 }

</bundles_post_ra>
